<compile_context>
chip_gen: v7x
topology: tpu7x:2x2x1
jax: 0.10.0
libtpu: 0.0.40
codegen_flags: <defaults>
</compile_context>

<pallas_src>
import functools

import jax
import jax.numpy as jnp
from jax.experimental import pallas as pl
from jax.experimental.pallas import tpu as pltpu

LANE = 128                   # lane width: pad hidden/action dims to this
SUBLANE = 8                  # sublane width: batch tile multiple
SINGLE_TILE_MAX_BATCH = 512  # below this, one grid step over the whole batch


def _round_up(n, m):
    return ((n + m - 1) // m) * m


def _pad_to(a, shape):
    pads = [(0, t - s) for s, t in zip(a.shape, shape)]
    return jnp.pad(a, pads) if any(p[1] for p in pads) else a


def dqn_kernel(x_ref, w1_ref, b1_ref, w2_ref, b2_ref, w3_ref, b3_ref, o_ref):
    # fc1 + ReLU  (bf16 MXU operands, f32 accumulate / elementwise)
    x = x_ref[...].astype(jnp.bfloat16)
    h1 = jnp.dot(x, w1_ref[...], preferred_element_type=jnp.float32)
    h1 = jnp.maximum(h1 + b1_ref[...], 0.0)
    # fc2 + ReLU
    h2 = jnp.dot(h1.astype(jnp.bfloat16), w2_ref[...],
                 preferred_element_type=jnp.float32)
    h2 = jnp.maximum(h2 + b2_ref[...], 0.0)
    # out (no activation)
    o = jnp.dot(h2.astype(jnp.bfloat16), w3_ref[...],
                preferred_element_type=jnp.float32)
    o_ref[...] = (o + b3_ref[...]).astype(o_ref.dtype)


def prepare_dqn_params(w1, b1, w2, b2, w3, b3):
    """Pad + cast the parameters ONCE, outside the per-call jitted path.

    Weights come in as [in_features, out_features] (transposed vs. torch),
    biases as [1, out_features]. Hidden/action dims are zero-padded to 128;
    the 14-wide state dim of w1 is left at its natural size. Zero weight
    cols/rows + zero bias padding make the padded output columns exactly 0.
    """
    state_size, hidden_size = w1.shape
    action_size = w3.shape[1]
    hp = _round_up(hidden_size, LANE)
    ap = _round_up(action_size, LANE)

    w1_p = _pad_to(w1, (state_size, hp)).astype(jnp.bfloat16)
    w2_p = _pad_to(w2, (hp, hp)).astype(jnp.bfloat16)
    w3_p = _pad_to(w3, (hp, ap)).astype(jnp.bfloat16)
    b1_p = _pad_to(b1, (1, hp)).astype(jnp.float32)
    b2_p = _pad_to(b2, (1, hp)).astype(jnp.float32)
    b3_p = _pad_to(b3, (1, ap)).astype(jnp.float32)
    return w1_p, b1_p, w2_p, b2_p, w3_p, b3_p


@functools.partial(jax.jit, static_argnames=("action_size", "block_batch"))
def dqn_forward(x, w1_p, b1_p, w2_p, b2_p, w3_p, b3_p, *,
                action_size, block_batch=512):
    batch, state_size = x.shape
    hp = w2_p.shape[0]
    ap = w3_p.shape[1]

    # Batch tile: single grid step for small batches; 256-multiple tiles for
    # large batches (MXU-friendly on v6e/v7x, ~85% HBM roofline, and with a
    # grid >= 2 the "parallel" axis lets v7x split batch over its 2 TCs).
    if batch <= SINGLE_TILE_MAX_BATCH:
        tb = _round_up(batch, SUBLANE)
    else:
        tb = max(256, min(_round_up(block_batch, 256), _round_up(batch, 256)))
    bp = _round_up(batch, tb)

    # Only batch rows of x may need padding; the state dim stays unpadded so
    # the per-sample streamed HBM read is not inflated.
    x_p = _pad_to(x, (bp, state_size))

    grid = (bp // tb,)

    def batch_map(i):
        return (i, 0)

    def const_map(i):
        return (0, 0)

    out_p = pl.pallas_call(
        dqn_kernel,
        out_shape=jax.ShapeDtypeStruct((bp, ap), jnp.float32),
        grid=grid,
        in_specs=[
            pl.BlockSpec((tb, state_size), batch_map),  # x: streamed, natural K
            pl.BlockSpec((state_size, hp), const_map),  # w1: VMEM-resident
            pl.BlockSpec((1, hp), const_map),           # b1
            pl.BlockSpec((hp, hp), const_map),          # w2
            pl.BlockSpec((1, hp), const_map),           # b2
            pl.BlockSpec((hp, ap), const_map),          # w3
            pl.BlockSpec((1, ap), const_map),           # b3
        ],
        out_specs=pl.BlockSpec((tb, ap), batch_map),    # lane-dense 128-wide
        compiler_params=pltpu.CompilerParams(
            dimension_semantics=("parallel",),          # v7x: 2-TC batch split
        ),
    )(x_p, w1_p, b1_p, w2_p, b2_p, w3_p, b3_p)

    # bp == round_up(batch, 8) for small batches, so the row slice is
    # near-free; the column slice fuses into this jit's epilogue.
    return out_p[:batch, :action_size]


def init_linear(key, fan_in, fan_out):
    """PyTorch nn.Linear-style init: U(-1/sqrt(fan_in), 1/sqrt(fan_in)).

    Weight returned as [fan_in, fan_out] (transposed vs. torch), bias [1, fan_out].
    """
    kw, kb = jax.random.split(key)
    bound = 1.0 / jnp.sqrt(jnp.float32(fan_in))
    w = jax.random.uniform(kw, (fan_in, fan_out), jnp.float32, -bound, bound)
    b = jax.random.uniform(kb, (1, fan_out), jnp.float32, -bound, bound)
    return w, b


if __name__ == "__main__":
    # Mancala-like sizes: 14 pits in the state, 6 legal actions, hidden=64.
    # Small batch (32) -> single grid step of 32 rows (no padded-row waste).
    batch, state_size, action_size, hidden_size = 32, 14, 6, 64

    key = jax.random.PRNGKey(0)
    kx, k1, k2, k3 = jax.random.split(key, 4)

    x = jax.random.normal(kx, (batch, state_size), jnp.float32)
    w1, b1 = init_linear(k1, state_size, hidden_size)
    w2, b2 = init_linear(k2, hidden_size, hidden_size)
    w3, b3 = init_linear(k3, hidden_size, action_size)

    # Parameter padding + bf16 cast hoisted out of the per-call hot path.
    params = prepare_dqn_params(w1, b1, w2, b2, w3, b3)

    out = dqn_forward(x, *params, action_size=action_size)
    out = jax.block_until_ready(out)

    # Pure-JAX f32 reference (tolerance relaxed for the bf16 MXU operands).
    h1 = jnp.maximum(x @ w1 + b1, 0.0)
    h2 = jnp.maximum(h1 @ w2 + b2, 0.0)
    ref = h2 @ w3 + b3
    assert out.shape == (batch, action_size)
    assert jnp.allclose(out, ref, atol=5e-2, rtol=5e-2), (
        float(jnp.max(jnp.abs(out - ref))))

    print("KERNEL_OK")
</pallas_src>

<mosaic_0001>
module attributes {stable_mosaic.version = 11 : i64} {
  func.func @dqn_kernel(%arg0: i32, %arg1: memref<32x14xf32, #tpu.memory_space<vmem>>, %arg2: memref<14x128xbf16, #tpu.memory_space<vmem>>, %arg3: memref<1x128xf32, #tpu.memory_space<vmem>>, %arg4: memref<128x128xbf16, #tpu.memory_space<vmem>>, %arg5: memref<1x128xf32, #tpu.memory_space<vmem>>, %arg6: memref<128x128xbf16, #tpu.memory_space<vmem>>, %arg7: memref<1x128xf32, #tpu.memory_space<vmem>>, %arg8: memref<32x128xf32, #tpu.memory_space<vmem>>) attributes {dimension_semantics = [#tpu.dimension_semantics<parallel>], iteration_bounds = array<i64: 1>, scalar_prefetch = 0 : i64, scratch_operands = 0 : i64, tpu.core_type = #tpu.core_type<tc>, window_params = [{transform_indices = @transform_0, window_bounds = array<i64: 32, 14>}, {pipeline_mode = #tpu.pipeline_mode<synchronous>, transform_indices = @transform_1, window_bounds = array<i64: 14, 128>}, {pipeline_mode = #tpu.pipeline_mode<synchronous>, transform_indices = @transform_2, window_bounds = array<i64: 1, 128>}, {pipeline_mode = #tpu.pipeline_mode<synchronous>, transform_indices = @transform_3, window_bounds = array<i64: 128, 128>}, {pipeline_mode = #tpu.pipeline_mode<synchronous>, transform_indices = @transform_4, window_bounds = array<i64: 1, 128>}, {pipeline_mode = #tpu.pipeline_mode<synchronous>, transform_indices = @transform_5, window_bounds = array<i64: 128, 128>}, {pipeline_mode = #tpu.pipeline_mode<synchronous>, transform_indices = @transform_6, window_bounds = array<i64: 1, 128>}, {transform_indices = @transform_7, window_bounds = array<i64: 32, 128>}]} {
    %c0 = arith.constant 0 : index
    %c0_0 = arith.constant 0 : index
    %0 = vector.load %arg1[%c0, %c0_0] : memref<32x14xf32, #tpu.memory_space<vmem>>, vector<32x14xf32>
    %1 = arith.truncf %0 : vector<32x14xf32> to vector<32x14xbf16>
    %c0_1 = arith.constant 0 : index
    %c0_2 = arith.constant 0 : index
    %2 = vector.load %arg2[%c0_1, %c0_2] : memref<14x128xbf16, #tpu.memory_space<vmem>>, vector<14x128xbf16>
    %cst = arith.constant dense<0.000000e+00> : vector<32x128xf32>
    %3 = tpu.matmul %1, %2, %cst {dimension_numbers = #tpu.dot_dimension_numbers<[1], [0], [0], [1], [0, 0, 1, 1], [], []>} : vector<32x14xbf16>, vector<14x128xbf16>, vector<32x128xf32> -> vector<32x128xf32>
    %c0_3 = arith.constant 0 : index
    %c0_4 = arith.constant 0 : index
    %4 = vector.load %arg3[%c0_3, %c0_4] : memref<1x128xf32, #tpu.memory_space<vmem>>, vector<1x128xf32>
    %5 = vector.broadcast %4 : vector<1x128xf32> to vector<32x128xf32>
    %6 = arith.addf %3, %5 : vector<32x128xf32>
    %cst_5 = arith.constant 0.000000e+00 : f32
    %7 = vector.broadcast %cst_5 : f32 to vector<32x128xf32>
    %8 = arith.maximumf %6, %7 : vector<32x128xf32>
    %9 = arith.truncf %8 : vector<32x128xf32> to vector<32x128xbf16>
    %c0_6 = arith.constant 0 : index
    %c0_7 = arith.constant 0 : index
    %10 = vector.load %arg4[%c0_6, %c0_7] : memref<128x128xbf16, #tpu.memory_space<vmem>>, vector<128x128xbf16>
    %cst_8 = arith.constant dense<0.000000e+00> : vector<32x128xf32>
    %11 = tpu.matmul %9, %10, %cst_8 {dimension_numbers = #tpu.dot_dimension_numbers<[1], [0], [0], [1], [0, 0, 1, 1], [], []>} : vector<32x128xbf16>, vector<128x128xbf16>, vector<32x128xf32> -> vector<32x128xf32>
    %c0_9 = arith.constant 0 : index
    %c0_10 = arith.constant 0 : index
    %12 = vector.load %arg5[%c0_9, %c0_10] : memref<1x128xf32, #tpu.memory_space<vmem>>, vector<1x128xf32>
    %13 = vector.broadcast %12 : vector<1x128xf32> to vector<32x128xf32>
    %14 = arith.addf %11, %13 : vector<32x128xf32>
    %cst_11 = arith.constant 0.000000e+00 : f32
    %15 = vector.broadcast %cst_11 : f32 to vector<32x128xf32>
    %16 = arith.maximumf %14, %15 : vector<32x128xf32>
    %17 = arith.truncf %16 : vector<32x128xf32> to vector<32x128xbf16>
    %c0_12 = arith.constant 0 : index
    %c0_13 = arith.constant 0 : index
    %18 = vector.load %arg6[%c0_12, %c0_13] : memref<128x128xbf16, #tpu.memory_space<vmem>>, vector<128x128xbf16>
    %cst_14 = arith.constant dense<0.000000e+00> : vector<32x128xf32>
    %19 = tpu.matmul %17, %18, %cst_14 {dimension_numbers = #tpu.dot_dimension_numbers<[1], [0], [0], [1], [0, 0, 1, 1], [], []>} : vector<32x128xbf16>, vector<128x128xbf16>, vector<32x128xf32> -> vector<32x128xf32>
    %c0_15 = arith.constant 0 : index
    %c0_16 = arith.constant 0 : index
    %20 = vector.load %arg7[%c0_15, %c0_16] : memref<1x128xf32, #tpu.memory_space<vmem>>, vector<1x128xf32>
    %21 = vector.broadcast %20 : vector<1x128xf32> to vector<32x128xf32>
    %22 = arith.addf %19, %21 : vector<32x128xf32>
    %c0_17 = arith.constant 0 : index
    %c0_18 = arith.constant 0 : index
    %23 = vector.load %arg8[%c0_17, %c0_18] : memref<32x128xf32, #tpu.memory_space<vmem>>, vector<32x128xf32>
    tpu.vector_store %arg8[%c0_17, %c0_18], %22 {strides = array<i32>} : memref<32x128xf32, #tpu.memory_space<vmem>>, vector<32x128xf32>,
    return
  }
  func.func @transform_0(%arg0: i32) -> (i32, i32) {
    %c0_i32 = arith.constant 0 : i32
    %c0_i32_0 = arith.constant 0 : i32
    return %arg0, %c0_i32 : i32, i32
  }
  func.func @transform_1(%arg0: i32) -> (i32, i32) {
    %c0_i32 = arith.constant 0 : i32
    %c0_i32_0 = arith.constant 0 : i32
    %c0_i32_1 = arith.constant 0 : i32
    return %c0_i32, %c0_i32_0 : i32, i32
  }
  func.func @transform_2(%arg0: i32) -> (i32, i32) {
    %c0_i32 = arith.constant 0 : i32
    %c0_i32_0 = arith.constant 0 : i32
    %c0_i32_1 = arith.constant 0 : i32
    return %c0_i32, %c0_i32_0 : i32, i32
  }
  func.func @transform_3(%arg0: i32) -> (i32, i32) {
    %c0_i32 = arith.constant 0 : i32
    %c0_i32_0 = arith.constant 0 : i32
    %c0_i32_1 = arith.constant 0 : i32
    return %c0_i32, %c0_i32_0 : i32, i32
  }
  func.func @transform_4(%arg0: i32) -> (i32, i32) {
    %c0_i32 = arith.constant 0 : i32
    %c0_i32_0 = arith.constant 0 : i32
    %c0_i32_1 = arith.constant 0 : i32
    return %c0_i32, %c0_i32_0 : i32, i32
  }
  func.func @transform_5(%arg0: i32) -> (i32, i32) {
    %c0_i32 = arith.constant 0 : i32
    %c0_i32_0 = arith.constant 0 : i32
    %c0_i32_1 = arith.constant 0 : i32
    return %c0_i32, %c0_i32_0 : i32, i32
  }
  func.func @transform_6(%arg0: i32) -> (i32, i32) {
    %c0_i32 = arith.constant 0 : i32
    %c0_i32_0 = arith.constant 0 : i32
    %c0_i32_1 = arith.constant 0 : i32
    return %c0_i32, %c0_i32_0 : i32, i32
  }
  func.func @transform_7(%arg0: i32) -> (i32, i32) {
    %c0_i32 = arith.constant 0 : i32
    %c0_i32_0 = arith.constant 0 : i32
    return %arg0, %c0_i32 : i32, i32
  }
}

</mosaic_0001>

<bundles_post_ra>
// kernel: dqn_forward.1
= control target key start
LH: loop header
LB: loop body
LE: loop exit
PB: predicated region body
PF: predicated region fallthrough
CT: control target
= control target key end

     0   :  { %12 = vsyncpa [#allocation3], 0  ;;  %s683_s0 = inlined_call_operand.vmem [shape: f32[32,14], index: 0, kind: input, shape index: {}]   ;;  %s684_s1 = inlined_call_operand.hbm [shape: bf16[14,128], index: 1, kind: input, shape index: {}]   ;;  %s685_s2 = inlined_call_operand.vmem [shape: f32[1,128], index: 2, kind: input, shape index: {}]   ;;  %s686_s3 = inlined_call_operand.hbm [shape: bf16[128,128], index: 3, kind: input, shape index: {}]   ;;  %s687_s4 = inlined_call_operand.vmem [shape: f32[1,128], index: 4, kind: input, shape index: {}]   ;;  %s688_s5 = inlined_call_operand.vmem [shape: bf16[128,128], index: 5, kind: input, shape index: {}]   ;;  %s689_s6 = inlined_call_operand.vmem [shape: f32[1,128], index: 6, kind: input, shape index: {}]   ;;  %s690_s7 = inlined_call_operand.vmem [shape: f32[32,128], index: 7, kind: output, shape index: {}]  }
   0x1   :  { %13 = vsyncpa [#allocation5], 0  ;;  %s558_s24 = smov [#allocation2]   ;;  %s510_s28 = scalar_lea.hbm %s684_s1, 128 }
   0x2   :  { %s21_s25 = sshll.u32 %s558_s24, 4  ;;  %p511_p0 = scmp.ne.s32.totalorder %s684_s1, %s510_s28  ;;  %s22_s25 = int_to_ptr.vmem [resolvable:$true] %s21_s25 }
   0x3   :  { %p514_p1 = scmp.lt.u32.totalorder %s510_s28, %s684_s1 }
   0x5   :  { %p516_p2 = pnand %p514_p1, %p511_p0 }
   0x7   :  { %519 = shalt.err (!%p516_p2)
}
   0x8   :  { %s520_s10 = scalar_lea.vmem %s22_s25, 128  ;;  %p525_p4 = scmp.lt.s32.totalorder %s22_s25, %s22_s25 }
   0x9   :  { %p521_p3 = scmp.ne.s32.totalorder %s22_s25, %s520_s10  ;;  %p526_p5 = scmp.lt.s32.totalorder %s520_s10, %s520_s10 }
   0xb   :  { %p527_p6 = por %p526_p5, %p525_p4 }
   0xd   :  { %p528_p7 = pnand %p527_p6, %p521_p3 }
   0xf   :  { %531 = shalt.err (!%p528_p7)
}
  0x10   :  { %s559_s11 = smov 64   ;;  %s560_s12 = smov 4  }
  0x11   :  { %27 = dma.hbm_to_vmem [thread:$0]  %s684_s1, 128, %s22_s25, [#allocation3], %s559_s11, %s559_s11, %s560_s12  }
  0x12   :  { %s561_s15 = smov [#allocation4]   ;;  %s532_s19 = scalar_lea.hbm %s686_s3, 1024 }
  0x13   :  { %s35_s16 = sshll.u32 %s561_s15, 4  ;;  %p533_p8 = scmp.ne.s32.totalorder %s686_s3, %s532_s19  ;;  %s36_s16 = int_to_ptr.vmem [resolvable:$true] %s35_s16 }
  0x14   :  { %p536_p9 = scmp.lt.u32.totalorder %s532_s19, %s686_s3 }
  0x16   :  { %p538_p10 = pnand %p536_p9, %p533_p8 }
  0x18   :  { %541 = shalt.err (!%p538_p10)
}
  0x19   :  { %s542_s24 = scalar_lea.vmem %s36_s16, 1024  ;;  %p547_p12 = scmp.lt.s32.totalorder %s36_s16, %s36_s16 }
  0x1a   :  { %p543_p11 = scmp.ne.s32.totalorder %s36_s16, %s542_s24  ;;  %p548_p13 = scmp.lt.s32.totalorder %s542_s24, %s542_s24 }
  0x1c   :  { %p549_p0 = por %p548_p13, %p547_p12 }
  0x1e   :  { %p550_p1 = pnand %p549_p0, %p543_p11 }
  0x20   :  { %553 = shalt.err (!%p550_p1)
}
  0x21   :  { %41 = dma.hbm_to_vmem [thread:$0]  %s686_s3, 1024, %s36_s16, [#allocation5], %s559_s11, %s559_s11, %s560_s12  }
  0x22   :  { %554 = dma.done.wait [#allocation3], 128  }
  0x23   :  { %555 = vsyncadd [#allocation3], 4294967168 }
  0x24   :  { %556 = dma.done.wait [#allocation5], 1024  }
  0x25   :  { %557 = vsyncadd [#allocation5], 4294966272  ;;  %vm82_vm0 = vcmask 1046528   ;;  %v493_v0 = vld [vmem:[#allocation2] sm:$0x7f]   ;;  %v56_v2 = vld [vmem:[%s683_s0 + $0x8] sm:$0xff] }
  0x26   :  { %v55_v1 = vld [vmem:[%s683_s0] sm:$0xff]  ;;  %vm75_vm1 = vcmask 113664   ;;  %v57_v3 = vld [vmem:[%s683_s0 + $0x10] sm:$0xff]  ;;  %488 = vmatprep.subr.msk.bf16.mxu0 %vm82_vm0, %v493_v0  ;;  %v84_v4 = vsel %vm82_vm0, %v493_v0, 0  ;;  %v58_v6 = vld [vmem:[%s683_s0 + $0x18] sm:$0xff] }
  0x27   :  { %v59_v5 = vpack.c.bf16 %v56_v2, %v55_v1  ;;  %443 = vmatpush3.bf16.msra.mxu0 %v84_v4  ;;  %v60_v7 = vpack.c.bf16 %v58_v6, %v57_v3  ;;  %v494_v8 = vld [vmem:[#allocation4] sm:$0xff]   ;;  %v495_v9 = vld [vmem:[#allocation4 + $0x8] sm:$0xff]   ;;  %v496_v10 = vld [vmem:[#allocation4 + $0x10] sm:$0xff]  }
  0x28   :  { %448 = vmatprep.subr.bf16.mxu1 %v494_v8  ;;  %v497_v11 = vld [vmem:[#allocation4 + $0x18] sm:$0xff]   ;;  %v498_v12 = vld [vmem:[#allocation4 + $0x20] sm:$0xff]   ;;  %v499_v13 = vld [vmem:[#allocation4 + $0x28] sm:$0xff]  }
  0x29   :  { %444 = vmatprep.mubr.msk.bf16.mxu0 %vm75_vm1, %v59_v5  ;;  %449 = vmatpush3.bf16.msra.mxu1 %v494_v8  ;;  %v500_v14 = vld [vmem:[#allocation4 + $0x30] sm:$0xff]   ;;  %v501_v15 = vld [vmem:[#allocation4 + $0x38] sm:$0xff]   ;;  %v503_v17 = vld [vmem:[%s688_s5 + $0x8] sm:$0xff]  }
  0x2a   :  { %445 = vmatmul.mubr.msk.bf16.vlgmr.msra.gmra.mrb[0].mxu0 %vm75_vm1, %v60_v7  ;;  %450 = vmatprep.subr.bf16.mxu1 %v495_v9  ;;  %v502_v16 = vld [vmem:[%s688_s5] sm:$0xff]   ;;  %v504_v18 = vld [vmem:[%s688_s5 + $0x10] sm:$0xff]   ;;  %v505_v19 = vld [vmem:[%s688_s5 + $0x18] sm:$0xff]  }
  0x2b   :  { %468 = vmatprep.subr.bf16.mxu0 %v502_v16  ;;  %v506_v20 = vld [vmem:[%s688_s5 + $0x20] sm:$0xff]   ;;  %v507_v21 = vld [vmem:[%s688_s5 + $0x28] sm:$0xff]   ;;  %v508_v37 = vld [vmem:[%s688_s5 + $0x30] sm:$0xff]  }
  0x2c   :  { %469 = vmatpush3.bf16.msra.mxu0 %v502_v16  ;;  %v397_v22 = vld [vmem:[%s685_s2] ss:$0 sm:$0xff]  ;;  %v509_v38 = vld [vmem:[%s688_s5 + $0x38] sm:$0xff]  }
  0x2d   :  { %451 = vmatpush3.bf16.msra.mxu1 %v495_v9  ;;  %470 = vmatprep.subr.bf16.mxu0 %v503_v17  ;;  %v401_v39 = vld [vmem:[%s687_s4] ss:$0 sm:$0xff] }
  0x2e   :  { %452 = vmatprep.subr.bf16.mxu1 %v496_v10  ;;  %v410_v54 = vld [vmem:[%s689_s6] ss:$0 sm:$0xff] }
  0x30   :  { %471 = vmatpush3.bf16.msra.mxu0 %v503_v17 }
  0x31   :  { %453 = vmatpush3.bf16.msra.mxu1 %v496_v10  ;;  %472 = vmatprep.subr.bf16.mxu0 %v504_v18 }
  0x32   :  { %454 = vmatprep.subr.bf16.mxu1 %v497_v11 }
  0x34   :  { %473 = vmatpush3.bf16.msra.mxu0 %v504_v18 }
  0x35   :  { %455 = vmatpush3.bf16.msra.mxu1 %v497_v11  ;;  %474 = vmatprep.subr.bf16.mxu0 %v505_v19 }
  0x36   :  { %456 = vmatprep.subr.bf16.mxu1 %v498_v12 }
  0x38   :  { %475 = vmatpush3.bf16.msra.mxu0 %v505_v19 }
  0x39   :  { %457 = vmatpush3.bf16.msra.mxu1 %v498_v12  ;;  %476 = vmatprep.subr.bf16.mxu0 %v506_v20 }
  0x3a   :  { %458 = vmatprep.subr.bf16.mxu1 %v499_v13 }
  0x3c   :  { %477 = vmatpush3.bf16.msra.mxu0 %v506_v20 }
  0x3d   :  { %459 = vmatpush3.bf16.msra.mxu1 %v499_v13  ;;  %478 = vmatprep.subr.bf16.mxu0 %v507_v21 }
  0x3e   :  { %460 = vmatprep.subr.bf16.mxu1 %v500_v14 }
  0x40   :  { %479 = vmatpush3.bf16.msra.mxu0 %v507_v21 }
  0x41   :  { %461 = vmatpush3.bf16.msra.mxu1 %v500_v14  ;;  %480 = vmatprep.subr.bf16.mxu0 %v508_v37 }
  0x42   :  { %462 = vmatprep.subr.bf16.mxu1 %v501_v15 }
  0x44   :  { %481 = vmatpush3.bf16.msra.mxu0 %v508_v37 }
  0x45   :  { %463 = vmatpush3.bf16.msra.mxu1 %v501_v15  ;;  %482 = vmatprep.subr.bf16.mxu0 %v509_v38 }
  0x48   :  { %483 = vmatpush3.bf16.msra.mxu0 %v509_v38 }
  0xfd   :  { %v446_v23 = vpop.f32.mrb[0].mxu0 }
  0xfe   :  { %v129_v24 = vadd.f32 %v446_v23, %v397_v22  ;;  %v120_v25 = vpop.f32.mrb[1].mxu0 }
  0xff   :  { %v121_v26 = vadd.f32 %v397_v22, %v120_v25  ;;  %v447_v27 = vpop.f32.mrb[2].mxu0 }
 0x100   :  { %v132_v28 = vadd.f32 %v447_v27, %v397_v22  ;;  %v123_v29 = vpop.f32.mrb[3].mxu0  ;;  %v137_v31 = vmax.f32 %v129_v24, 0.0 }
 0x101   :  { %v124_v30 = vadd.f32 %v397_v22, %v123_v29  ;;  %v135_v33 = vmax.f32 %v121_v26, 0.0 }
 0x102   :  { %v138_v32 = vmax.f32 %v132_v28, 0.0 }
 0x103   :  { %v136_v34 = vmax.f32 %v124_v30, 0.0 }
 0x104   :  { %v140_v35 = vpack.c.bf16 %v138_v32, %v137_v31 }
 0x105   :  { %v139_v36 = vpack.c.bf16 %v136_v34, %v135_v33 }
 0x107   :  { %464 = vmatprep.mubr.bf16.mxu1 %v139_v36 }
 0x108   :  { %465 = vmatmul.mubr.bf16.vlgmr.msra.gmra.mrb[0].mxu1 %v140_v35 }
 0x1db   :  { %v466_v40 = vpop.f32.mrb[0].mxu1 }
 0x1dc   :  { %v255_v41 = vadd.f32 %v466_v40, %v401_v39  ;;  %v246_v42 = vpop.f32.mrb[1].mxu1 }
 0x1dd   :  { %v247_v43 = vadd.f32 %v401_v39, %v246_v42  ;;  %v467_v44 = vpop.f32.mrb[2].mxu1 }
 0x1de   :  { %v258_v45 = vadd.f32 %v467_v44, %v401_v39  ;;  %v249_v46 = vpop.f32.mrb[3].mxu1  ;;  %v263_v48 = vmax.f32 %v255_v41, 0.0 }
 0x1df   :  { %v250_v47 = vadd.f32 %v401_v39, %v249_v46  ;;  %v261_v50 = vmax.f32 %v247_v43, 0.0 }
 0x1e0   :  { %v264_v49 = vmax.f32 %v258_v45, 0.0 }
 0x1e1   :  { %v262_v51 = vmax.f32 %v250_v47, 0.0 }
 0x1e2   :  { %v266_v52 = vpack.c.bf16 %v264_v49, %v263_v48 }
 0x1e3   :  { %v265_v53 = vpack.c.bf16 %v262_v51, %v261_v50 }
 0x1e5   :  { %484 = vmatprep.mubr.bf16.mxu0 %v265_v53 }
 0x1e6   :  { %485 = vmatmul.mubr.bf16.vlgmr.msra.gmra.mrb[4].mxu0 %v266_v52 }
 0x2b9   :  { %v486_v55 = vpop.f32.mrb[4].mxu0 }
 0x2ba   :  { %v381_v56 = vadd.f32 %v486_v55, %v410_v54  ;;  %v372_v57 = vpop.f32.mrb[5].mxu0 }
 0x2bb   :  { %v373_v58 = vadd.f32 %v410_v54, %v372_v57  ;;  %v487_v59 = vpop.f32.mrb[6].mxu0 }
 0x2bc   :  { %389 = vst [vmem:[%s690_s7 + $0x10] sm:$0xff] %v381_v56  ;;  %v384_v60 = vadd.f32 %v487_v59, %v410_v54  ;;  %v375_v61 = vpop.f32.mrb[7].mxu0 }
 0x2bd   :  { %387 = vst [vmem:[%s690_s7] sm:$0xff] %v373_v58  ;;  %v376_v62 = vadd.f32 %v410_v54, %v375_v61 }
 0x2be   :  { %390 = vst [vmem:[%s690_s7 + $0x18] sm:$0xff] %v384_v60 }
 0x2bf   :  { %388 = vst [vmem:[%s690_s7 + $0x8] sm:$0xff] %v376_v62 }
 0x2c0   :  { %395 = vsyncpa [#allocation3], 1 }
 0x2c1   :  { %396 = vsyncpa [#allocation5], 1 }

</bundles_post_ra>
